<compile_context>
chip_gen: v7x
topology: tpu7x:2x2x1
jax: 0.10.0
libtpu: 0.0.40
codegen_flags: <defaults>
</compile_context>

<pallas_src>
import jax
import jax.numpy as jnp
from jax.experimental import pallas as pl
from jax.experimental.pallas import tpu as pltpu


def _round_up(x, m):
    return (x + m - 1) // m * m


# ----------------------------- Pallas kernels ------------------------------- #

def _matmul_bias_relu_single_k_kernel(x_ref, w_ref, b_ref, o_ref):
    """One (tm, tn) output tile; the whole contraction fits one K tile."""
    acc = jnp.dot(x_ref[...], w_ref[...], preferred_element_type=jnp.float32)
    o_ref[...] = jnp.maximum(acc + b_ref[...], 0.0).astype(o_ref.dtype)


def _matmul_bias_relu_kloop_kernel(x_ref, w_ref, b_ref, o_ref, acc_ref):
    """One (tm, tn) output tile; K is the trailing reduction grid axis."""

    @pl.when(pl.program_id(2) == 0)
    def _init():
        acc_ref[...] = jnp.zeros_like(acc_ref)

    acc_ref[...] += jnp.dot(x_ref[...], w_ref[...],
                            preferred_element_type=jnp.float32)

    # bias + ReLU applied exactly once, after the full K reduction.
    @pl.when(pl.program_id(2) == pl.num_programs(2) - 1)
    def _finalize():
        o_ref[...] = jnp.maximum(acc_ref[...] + b_ref[...], 0.0).astype(o_ref.dtype)


def pallas_matmul_bias_relu(x, w, b, *, out_dtype=jnp.float32,
                            tm_max=256, tn_max=256, tk_max=512):
    """relu(x @ w + b) with a tiled Pallas kernel (bf16 operands, f32 accum).

    Operands are zero-padded to (16/128)-aligned tiles; the (M, N) result is
    sliced back out, so padding never changes the numerics.
    """
    M, K = x.shape
    K2, N = w.shape
    assert K == K2 and b.shape == (N,)

    tm = min(_round_up(M, 16), tm_max)        # sublane-aligned (bf16 packs 16)
    tn = min(_round_up(N, 128), tn_max)       # lane-dense output tiles
    tk = min(_round_up(K, 128), tk_max)       # MXU-aligned contraction
    Mp, Np, Kp = _round_up(M, tm), _round_up(N, tn), _round_up(K, tk)

    xp = jnp.pad(x.astype(jnp.bfloat16), ((0, Mp - M), (0, Kp - K)))
    wp = jnp.pad(w.astype(jnp.bfloat16), ((0, Kp - K), (0, Np - N)))
    bp = jnp.pad(b.astype(jnp.float32).reshape(1, N), ((0, 0), (0, Np - N)))

    if Kp == tk:
        # Whole contraction in one K tile: no scratch, no phase gates.
        grid = (Mp // tm, Np // tn)
        grid_spec = pltpu.PrefetchScalarGridSpec(
            num_scalar_prefetch=0,
            grid=grid,
            in_specs=[
                pl.BlockSpec((tm, tk), lambda i, j: (i, 0)),
                pl.BlockSpec((tk, tn), lambda i, j: (0, j)),
                pl.BlockSpec((1, tn), lambda i, j: (0, j)),
            ],
            out_specs=pl.BlockSpec((tm, tn), lambda i, j: (i, j)),
        )
        kernel = _matmul_bias_relu_single_k_kernel
        dims = ("parallel", "parallel")
    else:
        grid = (Mp // tm, Np // tn, Kp // tk)
        grid_spec = pltpu.PrefetchScalarGridSpec(
            num_scalar_prefetch=0,
            grid=grid,
            in_specs=[
                pl.BlockSpec((tm, tk), lambda i, j, k: (i, k)),
                pl.BlockSpec((tk, tn), lambda i, j, k: (k, j)),
                pl.BlockSpec((1, tn), lambda i, j, k: (0, j)),
            ],
            out_specs=pl.BlockSpec((tm, tn), lambda i, j, k: (i, j)),
            scratch_shapes=[pltpu.VMEM((tm, tn), jnp.float32)],
        )
        kernel = _matmul_bias_relu_kloop_kernel
        dims = ("parallel", "parallel", "arbitrary")

    out = pl.pallas_call(
        kernel,
        out_shape=jax.ShapeDtypeStruct((Mp, Np), out_dtype),
        grid_spec=grid_spec,
        compiler_params=pltpu.CompilerParams(
            dimension_semantics=dims,
            vmem_limit_bytes=32 * 1024 * 1024,
        ),
    )(xp, wp, bp)
    return out[:M, :N]


# ------------------------------ JAX glue ops -------------------------------- #

def conv2d_relu_nhwc(x_nhwc, w_flat, b, *, kernel=3, stride=2, padding=1):
    """Cross-correlation (torch.nn.Conv2d semantics) + bias + ReLU, NHWC in/out.

    Glue (pad / im2col, all in bf16) in plain JAX; matmul+bias+ReLU in Pallas.
    w_flat layout: [kernel*kernel*Cin, Cout] with K ordered (kh, kw, cin).
    """
    B, H, W, Cin = x_nhwc.shape
    Cout = w_flat.shape[1]
    x = x_nhwc.astype(jnp.bfloat16)                          # halve im2col bytes
    x = jnp.pad(x, ((0, 0), (padding, padding), (padding, padding), (0, 0)))
    Ho = (H + 2 * padding - kernel) // stride + 1
    Wo = (W + 2 * padding - kernel) // stride + 1
    cols = []
    for i in range(kernel):
        for j in range(kernel):
            cols.append(
                x[:, i:i + (Ho - 1) * stride + 1:stride,
                     j:j + (Wo - 1) * stride + 1:stride, :]
            )
    patches = jnp.concatenate(cols, axis=-1)                 # [B,Ho,Wo,k*k*Cin]
    patches = patches.reshape(B * Ho * Wo, kernel * kernel * Cin)
    out = pallas_matmul_bias_relu(patches, w_flat, b)        # hot path in Pallas
    return out.reshape(B, Ho, Wo, Cout)                      # stays NHWC


def interpolate_nearest(mask, out_h, out_w):
    """F.interpolate(mode='nearest') on [B, Hin, Win]: pure index-select."""
    B, Hin, Win = mask.shape
    idx_h = (jnp.arange(out_h) * Hin) // out_h               # floor(dst*in/out)
    idx_w = (jnp.arange(out_w) * Win) // out_w
    return mask[:, idx_h][:, :, idx_w]


# ------------------------------ BackboneBase -------------------------------- #

class BackboneBasePallas:
    """Pallas port of BackboneBase.forward with a synthetic 4-stage backbone."""

    CHANS = [4, 8, 16, 32, 64]   # Cin, layer1..layer4 output channels

    def __init__(self, key, train_backbone=True, num_channels=64,
                 return_interm_layers=True):
        del train_backbone  # only affects requires_grad (training), not forward
        k = 3
        self.params = []
        for li in range(4):
            key, kw, kb = jax.random.split(key, 3)
            cin, cout = self.CHANS[li], self.CHANS[li + 1]
            fan_in = k * k * cin
            w = jax.random.normal(kw, (fan_in, cout), jnp.float32) * (2.0 / fan_in) ** 0.5
            b = jax.random.normal(kb, (cout,), jnp.float32) * 0.01
            self.params.append((w, b))
        if return_interm_layers:
            self.return_layers = {0: '0', 1: '1', 2: '2', 3: '3'}
        else:
            self.return_layers = {3: '0'}
        self.num_channels = num_channels

    def forward(self, x, mask=None):
        # backbone body (IntermediateLayerGetter equivalent); NHWC internally,
        # NCHW only at the module boundary.
        h = jnp.transpose(x, (0, 2, 3, 1))                   # NCHW -> NHWC once
        xs = {}
        for li, (w, b) in enumerate(self.params):
            h = conv2d_relu_nhwc(h, w, b, kernel=3, stride=2, padding=1)
            if li in self.return_layers:
                xs[self.return_layers[li]] = h
        xs = {name: jnp.transpose(f, (0, 3, 1, 2)) for name, f in xs.items()}
        if mask is None:
            return xs
        out = {}
        for name, feat in xs.items():
            hf, wf = feat.shape[-2], feat.shape[-1]
            # NOTE: mask is re-assigned each iteration, exactly as in the
            # reference module (chained nearest-neighbour downsampling).
            mask = interpolate_nearest(mask, hf, wf)
            out[name] = (feat, mask)
        return out


# -------------------------- pure-JAX reference ------------------------------ #

def _ref_forward(x_nchw, params, kernel=3, stride=2, padding=1):
    feats = []
    h = x_nchw
    for (w_flat, b) in params:
        cin = h.shape[1]
        cout = w_flat.shape[1]
        wk = w_flat.reshape(kernel, kernel, cin, cout)       # (kh,kw,cin,cout)=HWIO
        h = jax.lax.conv_general_dilated(
            h, wk, window_strides=(stride, stride),
            padding=((padding, padding), (padding, padding)),
            dimension_numbers=("NCHW", "HWIO", "NCHW"))
        h = jnp.maximum(h + b.reshape(1, cout, 1, 1), 0.0)
        feats.append(h)
    return feats


# ---------------------------------- main ------------------------------------ #

if __name__ == "__main__":
    key = jax.random.PRNGKey(0)
    kx, km, kp = jax.random.split(key, 3)

    x = jax.random.normal(kx, (2, 4, 16, 16), jnp.float32)       # NCHW input
    mask = jax.random.uniform(km, (2, 16, 16)) > 0.3              # bool [B,H,W]

    model = BackboneBasePallas(kp, train_backbone=True, num_channels=64,
                               return_interm_layers=True)
    fwd = jax.jit(model.forward)
    out = jax.block_until_ready(fwd(x, mask))

    # shape / dtype checks
    assert out['0'][0].shape == (2, 8, 8, 8)
    assert out['1'][0].shape == (2, 16, 4, 4)
    assert out['2'][0].shape == (2, 32, 2, 2)
    assert out['3'][0].shape == (2, 64, 1, 1)
    assert out['0'][1].shape == (2, 8, 8) and out['0'][1].dtype == jnp.bool_
    assert out['3'][1].shape == (2, 1, 1) and out['3'][1].dtype == jnp.bool_

    # numerical check against a pure-JAX f32 reference (loose tol: bf16 MXU ops)
    ref_feats = _ref_forward(x, model.params)
    for idx, name in enumerate(('0', '1', '2', '3')):
        assert bool(jnp.allclose(out[name][0], ref_feats[idx],
                                 rtol=1e-1, atol=1e-1)), f"feature {name} mismatch"

    # nearest 16->8 with an integer ratio selects every other pixel
    assert bool(jnp.array_equal(out['0'][1], mask[:, ::2, ::2]))

    print("KERNEL_OK")
</pallas_src>

<mosaic_0001>
module attributes {stable_mosaic.version = 11 : i64} {
  func.func @_matmul_bias_relu_single_k_kernel(%arg0: i32, %arg1: i32, %arg2: memref<128x128xbf16, #tpu.memory_space<vmem>>, %arg3: memref<128x128xbf16, #tpu.memory_space<vmem>>, %arg4: memref<1x128xf32, #tpu.memory_space<vmem>>, %arg5: memref<128x128xf32, #tpu.memory_space<vmem>>) attributes {dimension_semantics = [#tpu.dimension_semantics<parallel>, #tpu.dimension_semantics<parallel>], iteration_bounds = array<i64: 1, 1>, scalar_prefetch = 0 : i64, scratch_operands = 0 : i64, tpu.core_type = #tpu.core_type<tc>, window_params = [{transform_indices = @transform_0, window_bounds = array<i64: 128, 128>}, {transform_indices = @transform_1, window_bounds = array<i64: 128, 128>}, {transform_indices = @transform_2, window_bounds = array<i64: 1, 128>}, {transform_indices = @transform_3, window_bounds = array<i64: 128, 128>}]} {
    %c0 = arith.constant 0 : index
    %c0_0 = arith.constant 0 : index
    %0 = vector.load %arg2[%c0, %c0_0] : memref<128x128xbf16, #tpu.memory_space<vmem>>, vector<128x128xbf16>
    %c0_1 = arith.constant 0 : index
    %c0_2 = arith.constant 0 : index
    %1 = vector.load %arg3[%c0_1, %c0_2] : memref<128x128xbf16, #tpu.memory_space<vmem>>, vector<128x128xbf16>
    %cst = arith.constant dense<0.000000e+00> : vector<128x128xf32>
    %2 = tpu.matmul %0, %1, %cst {dimension_numbers = #tpu.dot_dimension_numbers<[1], [0], [0], [1], [0, 0, 1, 1], [], []>} : vector<128x128xbf16>, vector<128x128xbf16>, vector<128x128xf32> -> vector<128x128xf32>
    %c0_3 = arith.constant 0 : index
    %c0_4 = arith.constant 0 : index
    %3 = vector.load %arg4[%c0_3, %c0_4] : memref<1x128xf32, #tpu.memory_space<vmem>>, vector<1x128xf32>
    %4 = vector.broadcast %3 : vector<1x128xf32> to vector<128x128xf32>
    %5 = arith.addf %2, %4 : vector<128x128xf32>
    %cst_5 = arith.constant 0.000000e+00 : f32
    %6 = vector.broadcast %cst_5 : f32 to vector<128x128xf32>
    %7 = arith.maximumf %5, %6 : vector<128x128xf32>
    %c0_6 = arith.constant 0 : index
    %c0_7 = arith.constant 0 : index
    %8 = vector.load %arg5[%c0_6, %c0_7] : memref<128x128xf32, #tpu.memory_space<vmem>>, vector<128x128xf32>
    tpu.vector_store %arg5[%c0_6, %c0_7], %7 {strides = array<i32>} : memref<128x128xf32, #tpu.memory_space<vmem>>, vector<128x128xf32>,
    return
  }
  func.func @transform_0(%arg0: i32, %arg1: i32) -> (i32, i32) {
    %c0_i32 = arith.constant 0 : i32
    %c0_i32_0 = arith.constant 0 : i32
    return %arg0, %c0_i32 : i32, i32
  }
  func.func @transform_1(%arg0: i32, %arg1: i32) -> (i32, i32) {
    %c0_i32 = arith.constant 0 : i32
    %c0_i32_0 = arith.constant 0 : i32
    return %c0_i32, %arg1 : i32, i32
  }
  func.func @transform_2(%arg0: i32, %arg1: i32) -> (i32, i32) {
    %c0_i32 = arith.constant 0 : i32
    %c0_i32_0 = arith.constant 0 : i32
    return %c0_i32, %arg1 : i32, i32
  }
  func.func @transform_3(%arg0: i32, %arg1: i32) -> (i32, i32) {
    %c0_i32 = arith.constant 0 : i32
    return %arg0, %arg1 : i32, i32
  }
}

module attributes {stable_mosaic.version = 11 : i64} {
  func.func @_matmul_bias_relu_single_k_kernel(%arg0: i32, %arg1: i32, %arg2: memref<32x128xbf16, #tpu.memory_space<vmem>>, %arg3: memref<128x128xbf16, #tpu.memory_space<vmem>>, %arg4: memref<1x128xf32, #tpu.memory_space<vmem>>, %arg5: memref<32x128xf32, #tpu.memory_space<vmem>>) attributes {dimension_semantics = [#tpu.dimension_semantics<parallel>, #tpu.dimension_semantics<parallel>], iteration_bounds = array<i64: 1, 1>, scalar_prefetch = 0 : i64, scratch_operands = 0 : i64, tpu.core_type = #tpu.core_type<tc>, window_params = [{transform_indices = @transform_0, window_bounds = array<i64: 32, 128>}, {transform_indices = @transform_1, window_bounds = array<i64: 128, 128>}, {transform_indices = @transform_2, window_bounds = array<i64: 1, 128>}, {transform_indices = @transform_3, window_bounds = array<i64: 32, 128>}]} {
    %c0 = arith.constant 0 : index
    %c0_0 = arith.constant 0 : index
    %0 = vector.load %arg2[%c0, %c0_0] : memref<32x128xbf16, #tpu.memory_space<vmem>>, vector<32x128xbf16>
    %c0_1 = arith.constant 0 : index
    %c0_2 = arith.constant 0 : index
    %1 = vector.load %arg3[%c0_1, %c0_2] : memref<128x128xbf16, #tpu.memory_space<vmem>>, vector<128x128xbf16>
    %cst = arith.constant dense<0.000000e+00> : vector<32x128xf32>
    %2 = tpu.matmul %0, %1, %cst {dimension_numbers = #tpu.dot_dimension_numbers<[1], [0], [0], [1], [0, 0, 1, 1], [], []>} : vector<32x128xbf16>, vector<128x128xbf16>, vector<32x128xf32> -> vector<32x128xf32>
    %c0_3 = arith.constant 0 : index
    %c0_4 = arith.constant 0 : index
    %3 = vector.load %arg4[%c0_3, %c0_4] : memref<1x128xf32, #tpu.memory_space<vmem>>, vector<1x128xf32>
    %4 = vector.broadcast %3 : vector<1x128xf32> to vector<32x128xf32>
    %5 = arith.addf %2, %4 : vector<32x128xf32>
    %cst_5 = arith.constant 0.000000e+00 : f32
    %6 = vector.broadcast %cst_5 : f32 to vector<32x128xf32>
    %7 = arith.maximumf %5, %6 : vector<32x128xf32>
    %c0_6 = arith.constant 0 : index
    %c0_7 = arith.constant 0 : index
    %8 = vector.load %arg5[%c0_6, %c0_7] : memref<32x128xf32, #tpu.memory_space<vmem>>, vector<32x128xf32>
    tpu.vector_store %arg5[%c0_6, %c0_7], %7 {strides = array<i32>} : memref<32x128xf32, #tpu.memory_space<vmem>>, vector<32x128xf32>,
    return
  }
  func.func @transform_0(%arg0: i32, %arg1: i32) -> (i32, i32) {
    %c0_i32 = arith.constant 0 : i32
    %c0_i32_0 = arith.constant 0 : i32
    return %arg0, %c0_i32 : i32, i32
  }
  func.func @transform_1(%arg0: i32, %arg1: i32) -> (i32, i32) {
    %c0_i32 = arith.constant 0 : i32
    %c0_i32_0 = arith.constant 0 : i32
    return %c0_i32, %arg1 : i32, i32
  }
  func.func @transform_2(%arg0: i32, %arg1: i32) -> (i32, i32) {
    %c0_i32 = arith.constant 0 : i32
    %c0_i32_0 = arith.constant 0 : i32
    return %c0_i32, %arg1 : i32, i32
  }
  func.func @transform_3(%arg0: i32, %arg1: i32) -> (i32, i32) {
    %c0_i32 = arith.constant 0 : i32
    return %arg0, %arg1 : i32, i32
  }
}

module attributes {stable_mosaic.version = 11 : i64} {
  func.func @_matmul_bias_relu_single_k_kernel(%arg0: i32, %arg1: i32, %arg2: memref<16x256xbf16, #tpu.memory_space<vmem>>, %arg3: memref<256x128xbf16, #tpu.memory_space<vmem>>, %arg4: memref<1x128xf32, #tpu.memory_space<vmem>>, %arg5: memref<16x128xf32, #tpu.memory_space<vmem>>) attributes {dimension_semantics = [#tpu.dimension_semantics<parallel>, #tpu.dimension_semantics<parallel>], iteration_bounds = array<i64: 1, 1>, scalar_prefetch = 0 : i64, scratch_operands = 0 : i64, tpu.core_type = #tpu.core_type<tc>, window_params = [{transform_indices = @transform_0, window_bounds = array<i64: 16, 256>}, {transform_indices = @transform_1, window_bounds = array<i64: 256, 128>}, {transform_indices = @transform_2, window_bounds = array<i64: 1, 128>}, {transform_indices = @transform_3, window_bounds = array<i64: 16, 128>}]} {
    %c0 = arith.constant 0 : index
    %c0_0 = arith.constant 0 : index
    %0 = vector.load %arg2[%c0, %c0_0] : memref<16x256xbf16, #tpu.memory_space<vmem>>, vector<16x256xbf16>
    %c0_1 = arith.constant 0 : index
    %c0_2 = arith.constant 0 : index
    %1 = vector.load %arg3[%c0_1, %c0_2] : memref<256x128xbf16, #tpu.memory_space<vmem>>, vector<256x128xbf16>
    %cst = arith.constant dense<0.000000e+00> : vector<16x128xf32>
    %2 = tpu.matmul %0, %1, %cst {dimension_numbers = #tpu.dot_dimension_numbers<[1], [0], [0], [1], [0, 0, 1, 1], [], []>} : vector<16x256xbf16>, vector<256x128xbf16>, vector<16x128xf32> -> vector<16x128xf32>
    %c0_3 = arith.constant 0 : index
    %c0_4 = arith.constant 0 : index
    %3 = vector.load %arg4[%c0_3, %c0_4] : memref<1x128xf32, #tpu.memory_space<vmem>>, vector<1x128xf32>
    %4 = vector.broadcast %3 : vector<1x128xf32> to vector<16x128xf32>
    %5 = arith.addf %2, %4 : vector<16x128xf32>
    %cst_5 = arith.constant 0.000000e+00 : f32
    %6 = vector.broadcast %cst_5 : f32 to vector<16x128xf32>
    %7 = arith.maximumf %5, %6 : vector<16x128xf32>
    %c0_6 = arith.constant 0 : index
    %c0_7 = arith.constant 0 : index
    %8 = vector.load %arg5[%c0_6, %c0_7] : memref<16x128xf32, #tpu.memory_space<vmem>>, vector<16x128xf32>
    tpu.vector_store %arg5[%c0_6, %c0_7], %7 {strides = array<i32>} : memref<16x128xf32, #tpu.memory_space<vmem>>, vector<16x128xf32>,
    return
  }
  func.func @transform_0(%arg0: i32, %arg1: i32) -> (i32, i32) {
    %c0_i32 = arith.constant 0 : i32
    %c0_i32_0 = arith.constant 0 : i32
    return %arg0, %c0_i32 : i32, i32
  }
  func.func @transform_1(%arg0: i32, %arg1: i32) -> (i32, i32) {
    %c0_i32 = arith.constant 0 : i32
    %c0_i32_0 = arith.constant 0 : i32
    return %c0_i32, %arg1 : i32, i32
  }
  func.func @transform_2(%arg0: i32, %arg1: i32) -> (i32, i32) {
    %c0_i32 = arith.constant 0 : i32
    %c0_i32_0 = arith.constant 0 : i32
    return %c0_i32, %arg1 : i32, i32
  }
  func.func @transform_3(%arg0: i32, %arg1: i32) -> (i32, i32) {
    %c0_i32 = arith.constant 0 : i32
    return %arg0, %arg1 : i32, i32
  }
}

module attributes {stable_mosaic.version = 11 : i64} {
  func.func @_matmul_bias_relu_single_k_kernel(%arg0: i32, %arg1: i32, %arg2: memref<16x384xbf16, #tpu.memory_space<vmem>>, %arg3: memref<384x128xbf16, #tpu.memory_space<vmem>>, %arg4: memref<1x128xf32, #tpu.memory_space<vmem>>, %arg5: memref<16x128xf32, #tpu.memory_space<vmem>>) attributes {dimension_semantics = [#tpu.dimension_semantics<parallel>, #tpu.dimension_semantics<parallel>], iteration_bounds = array<i64: 1, 1>, scalar_prefetch = 0 : i64, scratch_operands = 0 : i64, tpu.core_type = #tpu.core_type<tc>, window_params = [{transform_indices = @transform_0, window_bounds = array<i64: 16, 384>}, {transform_indices = @transform_1, window_bounds = array<i64: 384, 128>}, {transform_indices = @transform_2, window_bounds = array<i64: 1, 128>}, {transform_indices = @transform_3, window_bounds = array<i64: 16, 128>}]} {
    %c0 = arith.constant 0 : index
    %c0_0 = arith.constant 0 : index
    %0 = vector.load %arg2[%c0, %c0_0] : memref<16x384xbf16, #tpu.memory_space<vmem>>, vector<16x384xbf16>
    %c0_1 = arith.constant 0 : index
    %c0_2 = arith.constant 0 : index
    %1 = vector.load %arg3[%c0_1, %c0_2] : memref<384x128xbf16, #tpu.memory_space<vmem>>, vector<384x128xbf16>
    %cst = arith.constant dense<0.000000e+00> : vector<16x128xf32>
    %2 = tpu.matmul %0, %1, %cst {dimension_numbers = #tpu.dot_dimension_numbers<[1], [0], [0], [1], [0, 0, 1, 1], [], []>} : vector<16x384xbf16>, vector<384x128xbf16>, vector<16x128xf32> -> vector<16x128xf32>
    %c0_3 = arith.constant 0 : index
    %c0_4 = arith.constant 0 : index
    %3 = vector.load %arg4[%c0_3, %c0_4] : memref<1x128xf32, #tpu.memory_space<vmem>>, vector<1x128xf32>
    %4 = vector.broadcast %3 : vector<1x128xf32> to vector<16x128xf32>
    %5 = arith.addf %2, %4 : vector<16x128xf32>
    %cst_5 = arith.constant 0.000000e+00 : f32
    %6 = vector.broadcast %cst_5 : f32 to vector<16x128xf32>
    %7 = arith.maximumf %5, %6 : vector<16x128xf32>
    %c0_6 = arith.constant 0 : index
    %c0_7 = arith.constant 0 : index
    %8 = vector.load %arg5[%c0_6, %c0_7] : memref<16x128xf32, #tpu.memory_space<vmem>>, vector<16x128xf32>
    tpu.vector_store %arg5[%c0_6, %c0_7], %7 {strides = array<i32>} : memref<16x128xf32, #tpu.memory_space<vmem>>, vector<16x128xf32>,
    return
  }
  func.func @transform_0(%arg0: i32, %arg1: i32) -> (i32, i32) {
    %c0_i32 = arith.constant 0 : i32
    %c0_i32_0 = arith.constant 0 : i32
    return %arg0, %c0_i32 : i32, i32
  }
  func.func @transform_1(%arg0: i32, %arg1: i32) -> (i32, i32) {
    %c0_i32 = arith.constant 0 : i32
    %c0_i32_0 = arith.constant 0 : i32
    return %c0_i32, %arg1 : i32, i32
  }
  func.func @transform_2(%arg0: i32, %arg1: i32) -> (i32, i32) {
    %c0_i32 = arith.constant 0 : i32
    %c0_i32_0 = arith.constant 0 : i32
    return %c0_i32, %arg1 : i32, i32
  }
  func.func @transform_3(%arg0: i32, %arg1: i32) -> (i32, i32) {
    %c0_i32 = arith.constant 0 : i32
    return %arg0, %arg1 : i32, i32
  }
}

</mosaic_0001>

<bundles_post_ra>
// kernel: forward.4
= control target key start
LH: loop header
LB: loop body
LE: loop exit
PB: predicated region body
PF: predicated region fallthrough
CT: control target
= control target key end

     0   :  { %s499_s1 = inlined_call_operand.vmem [shape: bf16[128,128], index: 1, kind: input, shape index: {}]   ;;  %s500_s0 = inlined_call_operand.vmem [shape: bf16[128,128], index: 0, kind: input, shape index: {}]   ;;  %s501_s2 = inlined_call_operand.vmem [shape: f32[1,128], index: 2, kind: input, shape index: {}]   ;;  %s502_s3 = inlined_call_operand.vmem [shape: f32[128,128], index: 3, kind: output, shape index: {}]  }
   0x1   :  { %v364_v0 = vld [vmem:[%s499_s1] sm:$0xff]   ;;  %v365_v1 = vld [vmem:[%s499_s1 + $0x8] sm:$0xff]   ;;  %v366_v2 = vld [vmem:[%s499_s1 + $0x10] sm:$0xff]  }
   0x2   :  { %316 = vmatprep.subr.bf16.mxu0 %v364_v0  ;;  %348 = vmatprep.subr.bf16.mxu1 %v364_v0  ;;  %v367_v3 = vld [vmem:[%s499_s1 + $0x18] sm:$0xff]   ;;  %v372_v4 = vld [vmem:[%s500_s0] sm:$0xff]   ;;  %v369_v7 = vld [vmem:[%s499_s1 + $0x28] sm:$0xff]  }
   0x3   :  { %317 = vmatpush3.bf16.msra.mxu0 %v364_v0  ;;  %356 = vmatpush3.bf16.msra.mxu1 %v364_v0  ;;  %v373_v5 = vld [vmem:[%s500_s0 + $0x20] sm:$0xff]   ;;  %v370_v8 = vld [vmem:[%s499_s1 + $0x30] sm:$0xff]   ;;  %v371_v9 = vld [vmem:[%s499_s1 + $0x38] sm:$0xff]  }
   0x4   :  { %318 = vmatprep.subr.bf16.mxu0 %v365_v1  ;;  %349 = vmatprep.subr.bf16.mxu1 %v365_v1  ;;  %v368_v6 = vld [vmem:[%s499_s1 + $0x20] sm:$0xff]   ;;  %v374_v10 = vld [vmem:[%s500_s0 + $0x8] sm:$0xff]   ;;  %v376_v12 = vld [vmem:[%s500_s0 + $0x10] sm:$0xff]  }
   0x5   :  { %332 = vmatprep.mubr.bf16.mxu0 %v372_v4  ;;  %340 = vmatprep.mubr.bf16.mxu1 %v373_v5  ;;  %v375_v11 = vld [vmem:[%s500_s0 + $0x28] sm:$0xff]   ;;  %v377_v13 = vld [vmem:[%s500_s0 + $0x30] sm:$0xff]   ;;  %v378_v14 = vld [vmem:[%s500_s0 + $0x18] sm:$0xff]  }
   0x6   :  { %v379_v15 = vld [vmem:[%s500_s0 + $0x38] sm:$0xff]   ;;  %v283_v16 = vld [vmem:[%s501_s2] ss:$0 sm:$0xff] }
   0x7   :  { %319 = vmatpush3.bf16.msra.mxu0 %v365_v1  ;;  %357 = vmatpush3.bf16.msra.mxu1 %v365_v1 }
   0x8   :  { %320 = vmatprep.subr.bf16.mxu0 %v366_v2  ;;  %350 = vmatprep.subr.bf16.mxu1 %v366_v2 }
   0xb   :  { %321 = vmatpush3.bf16.msra.mxu0 %v366_v2  ;;  %358 = vmatpush3.bf16.msra.mxu1 %v366_v2 }
   0xc   :  { %322 = vmatprep.subr.bf16.mxu0 %v367_v3  ;;  %351 = vmatprep.subr.bf16.mxu1 %v367_v3 }
   0xf   :  { %323 = vmatpush3.bf16.msra.mxu0 %v367_v3  ;;  %359 = vmatpush3.bf16.msra.mxu1 %v367_v3 }
  0x10   :  { %324 = vmatprep.subr.bf16.mxu0 %v368_v6  ;;  %352 = vmatprep.subr.bf16.mxu1 %v368_v6 }
  0x13   :  { %325 = vmatpush3.bf16.msra.mxu0 %v368_v6  ;;  %360 = vmatpush3.bf16.msra.mxu1 %v368_v6 }
  0x14   :  { %326 = vmatprep.subr.bf16.mxu0 %v369_v7  ;;  %353 = vmatprep.subr.bf16.mxu1 %v369_v7 }
  0x17   :  { %327 = vmatpush3.bf16.msra.mxu0 %v369_v7  ;;  %361 = vmatpush3.bf16.msra.mxu1 %v369_v7 }
  0x18   :  { %328 = vmatprep.subr.bf16.mxu0 %v370_v8  ;;  %354 = vmatprep.subr.bf16.mxu1 %v370_v8 }
  0x1b   :  { %329 = vmatpush3.bf16.msra.mxu0 %v370_v8  ;;  %362 = vmatpush3.bf16.msra.mxu1 %v370_v8 }
  0x1c   :  { %330 = vmatprep.subr.bf16.mxu0 %v371_v9  ;;  %355 = vmatprep.subr.bf16.mxu1 %v371_v9 }
  0x1f   :  { %331 = vmatpush3.bf16.msra.mxu0 %v371_v9  ;;  %363 = vmatpush3.bf16.msra.mxu1 %v371_v9 }
  0x22   :  { %333 = vmatmul.mubr.bf16.vlgmr.msra.gmra.mrb[0].mxu0 %v374_v10  ;;  %341 = vmatmul.mubr.bf16.vlgmr.msra.gmra.mrb[0].mxu1 %v375_v11 }
  0x23   :  { %336 = vmatprep.mubr.bf16.mxu0 %v376_v12  ;;  %344 = vmatprep.mubr.bf16.mxu1 %v377_v13 }
  0x2a   :  { %337 = vmatmul.mubr.bf16.gmra.mrb[4].mxu0 %v378_v14  ;;  %345 = vmatmul.mubr.bf16.gmra.mrb[4].mxu1 %v379_v15 }
  0xf5   :  { %v334_v17 = vpop.f32.mrb[0].mxu0  ;;  %v342_v18 = vpop.f32.mrb[0].mxu1 }
  0xf6   :  { %v193_v19 = vadd.f32 %v334_v17, %v283_v16  ;;  %v225_v20 = vadd.f32 %v342_v18, %v283_v16  ;;  %v184_v21 = vpop.f32.mrb[1].mxu0  ;;  %v216_v22 = vpop.f32.mrb[1].mxu1 }
  0xf7   :  { %v185_v23 = vadd.f32 %v283_v16, %v184_v21  ;;  %v217_v24 = vadd.f32 %v283_v16, %v216_v22  ;;  %v335_v25 = vpop.f32.mrb[2].mxu0  ;;  %v343_v26 = vpop.f32.mrb[2].mxu1 }
  0xf8   :  { %v249_v27 = vmax.f32 %v193_v19, 0.0  ;;  %v257_v28 = vmax.f32 %v225_v20, 0.0  ;;  %v196_v29 = vadd.f32 %v335_v25, %v283_v16  ;;  %v228_v30 = vadd.f32 %v343_v26, %v283_v16  ;;  %v187_v31 = vpop.f32.mrb[3].mxu0  ;;  %v219_v32 = vpop.f32.mrb[3].mxu1 }
  0xf9   :  { %v247_v33 = vmax.f32 %v185_v23, 0.0  ;;  %v255_v34 = vmax.f32 %v217_v24, 0.0  ;;  %v188_v35 = vadd.f32 %v283_v16, %v187_v31  ;;  %v220_v36 = vadd.f32 %v283_v16, %v219_v32 }
  0xfa   :  { %265 = vst [vmem:[%s502_s3 + $0x10] sm:$0xff] %v249_v27  ;;  %273 = vst [vmem:[%s502_s3 + $0x50] sm:$0xff] %v257_v28  ;;  %v250_v37 = vmax.f32 %v196_v29, 0.0  ;;  %v258_v38 = vmax.f32 %v228_v30, 0.0 }
  0xfb   :  { %263 = vst [vmem:[%s502_s3] sm:$0xff] %v247_v33  ;;  %271 = vst [vmem:[%s502_s3 + $0x40] sm:$0xff] %v255_v34  ;;  %v248_v39 = vmax.f32 %v188_v35, 0.0  ;;  %v256_v40 = vmax.f32 %v220_v36, 0.0 }
  0xfc   :  { %266 = vst [vmem:[%s502_s3 + $0x18] sm:$0xff] %v250_v37  ;;  %274 = vst [vmem:[%s502_s3 + $0x58] sm:$0xff] %v258_v38 }
  0xfd   :  { %264 = vst [vmem:[%s502_s3 + $0x8] sm:$0xff] %v248_v39  ;;  %272 = vst [vmem:[%s502_s3 + $0x48] sm:$0xff] %v256_v40  ;;  %v338_v41 = vpop.f32.mrb[4].mxu0  ;;  %v346_v42 = vpop.f32.mrb[4].mxu1 }
  0xfe   :  { %v209_v43 = vadd.f32 %v338_v41, %v283_v16  ;;  %v241_v44 = vadd.f32 %v346_v42, %v283_v16  ;;  %v200_v45 = vpop.f32.mrb[5].mxu0  ;;  %v232_v46 = vpop.f32.mrb[5].mxu1 }
  0xff   :  { %v201_v47 = vadd.f32 %v283_v16, %v200_v45  ;;  %v233_v48 = vadd.f32 %v283_v16, %v232_v46  ;;  %v339_v49 = vpop.f32.mrb[6].mxu0  ;;  %v347_v50 = vpop.f32.mrb[6].mxu1 }
 0x100   :  { %v253_v51 = vmax.f32 %v209_v43, 0.0  ;;  %v261_v52 = vmax.f32 %v241_v44, 0.0  ;;  %v212_v53 = vadd.f32 %v339_v49, %v283_v16  ;;  %v244_v54 = vadd.f32 %v347_v50, %v283_v16  ;;  %v203_v55 = vpop.f32.mrb[7].mxu0  ;;  %v235_v56 = vpop.f32.mrb[7].mxu1 }
 0x101   :  { %v251_v57 = vmax.f32 %v201_v47, 0.0  ;;  %v259_v58 = vmax.f32 %v233_v48, 0.0  ;;  %v204_v59 = vadd.f32 %v283_v16, %v203_v55  ;;  %v236_v60 = vadd.f32 %v283_v16, %v235_v56 }
 0x102   :  { %269 = vst [vmem:[%s502_s3 + $0x30] sm:$0xff] %v253_v51  ;;  %277 = vst [vmem:[%s502_s3 + $0x70] sm:$0xff] %v261_v52  ;;  %v254_v61 = vmax.f32 %v212_v53, 0.0  ;;  %v262_v62 = vmax.f32 %v244_v54, 0.0 }
 0x103   :  { %267 = vst [vmem:[%s502_s3 + $0x20] sm:$0xff] %v251_v57  ;;  %275 = vst [vmem:[%s502_s3 + $0x60] sm:$0xff] %v259_v58  ;;  %v252_v63 = vmax.f32 %v204_v59, 0.0  ;;  %v260_v0 = vmax.f32 %v236_v60, 0.0 }
 0x104   :  { %270 = vst [vmem:[%s502_s3 + $0x38] sm:$0xff] %v254_v61  ;;  %278 = vst [vmem:[%s502_s3 + $0x78] sm:$0xff] %v262_v62 }
 0x105   :  { %268 = vst [vmem:[%s502_s3 + $0x28] sm:$0xff] %v252_v63  ;;  %276 = vst [vmem:[%s502_s3 + $0x68] sm:$0xff] %v260_v0 }

// kernel: forward.5
= control target key start
LH: loop header
LB: loop body
LE: loop exit
PB: predicated region body
PF: predicated region fallthrough
CT: control target
= control target key end

     0   :  { %s279_s1 = inlined_call_operand.vmem [shape: bf16[128,128], index: 1, kind: input, shape index: {}]   ;;  %s280_s0 = inlined_call_operand.vmem [shape: bf16[32,128], index: 0, kind: input, shape index: {}]   ;;  %s281_s2 = inlined_call_operand.vmem [shape: f32[1,128], index: 2, kind: input, shape index: {}]   ;;  %s282_s3 = inlined_call_operand.vmem [shape: f32[32,128], index: 3, kind: output, shape index: {}]  }
   0x1   :  { %v204_v0 = vld [vmem:[%s279_s1] sm:$0xff]   ;;  %v205_v1 = vld [vmem:[%s279_s1 + $0x8] sm:$0xff]   ;;  %v206_v2 = vld [vmem:[%s279_s1 + $0x10] sm:$0xff]  }
   0x2   :  { %184 = vmatprep.subr.bf16.mxu0 %v204_v0  ;;  %v207_v3 = vld [vmem:[%s279_s1 + $0x18] sm:$0xff]   ;;  %v212_v4 = vld [vmem:[%s280_s0] sm:$0xff]   ;;  %v209_v6 = vld [vmem:[%s279_s1 + $0x28] sm:$0xff]  }
   0x3   :  { %185 = vmatpush3.bf16.msra.mxu0 %v204_v0  ;;  %200 = vmatprep.mubr.bf16.mxu0 %v212_v4  ;;  %v208_v5 = vld [vmem:[%s279_s1 + $0x20] sm:$0xff]   ;;  %v210_v7 = vld [vmem:[%s279_s1 + $0x30] sm:$0xff]   ;;  %v211_v8 = vld [vmem:[%s279_s1 + $0x38] sm:$0xff]  }
   0x4   :  { %186 = vmatprep.subr.bf16.mxu0 %v205_v1  ;;  %v213_v9 = vld [vmem:[%s280_s0 + $0x8] sm:$0xff]   ;;  %v163_v10 = vld [vmem:[%s281_s2] ss:$0 sm:$0xff] }
   0x7   :  { %187 = vmatpush3.bf16.msra.mxu0 %v205_v1 }
   0x8   :  { %188 = vmatprep.subr.bf16.mxu0 %v206_v2 }
   0xb   :  { %189 = vmatpush3.bf16.msra.mxu0 %v206_v2 }
   0xc   :  { %190 = vmatprep.subr.bf16.mxu0 %v207_v3 }
   0xf   :  { %191 = vmatpush3.bf16.msra.mxu0 %v207_v3 }
  0x10   :  { %192 = vmatprep.subr.bf16.mxu0 %v208_v5 }
  0x13   :  { %193 = vmatpush3.bf16.msra.mxu0 %v208_v5 }
  0x14   :  { %194 = vmatprep.subr.bf16.mxu0 %v209_v6 }
  0x17   :  { %195 = vmatpush3.bf16.msra.mxu0 %v209_v6 }
  0x18   :  { %196 = vmatprep.subr.bf16.mxu0 %v210_v7 }
  0x1b   :  { %197 = vmatpush3.bf16.msra.mxu0 %v210_v7 }
  0x1c   :  { %198 = vmatprep.subr.bf16.mxu0 %v211_v8 }
  0x1f   :  { %199 = vmatpush3.bf16.msra.mxu0 %v211_v8 }
  0x22   :  { %201 = vmatmul.mubr.bf16.vlgmr.msra.gmra.mrb[0].mxu0 %v213_v9 }
  0xf5   :  { %v202_v11 = vpop.f32.mrb[0].mxu0 }
  0xf6   :  { %v145_v12 = vadd.f32 %v202_v11, %v163_v10  ;;  %v136_v13 = vpop.f32.mrb[1].mxu0 }
  0xf7   :  { %v137_v14 = vadd.f32 %v163_v10, %v136_v13  ;;  %v203_v15 = vpop.f32.mrb[2].mxu0 }
  0xf8   :  { %v153_v16 = vmax.f32 %v145_v12, 0.0  ;;  %v148_v17 = vadd.f32 %v203_v15, %v163_v10  ;;  %v139_v18 = vpop.f32.mrb[3].mxu0 }
  0xf9   :  { %v151_v19 = vmax.f32 %v137_v14, 0.0  ;;  %v140_v20 = vadd.f32 %v163_v10, %v139_v18 }
  0xfa   :  { %157 = vst [vmem:[%s282_s3 + $0x10] sm:$0xff] %v153_v16  ;;  %v154_v21 = vmax.f32 %v148_v17, 0.0 }
  0xfb   :  { %155 = vst [vmem:[%s282_s3] sm:$0xff] %v151_v19  ;;  %v152_v22 = vmax.f32 %v140_v20, 0.0 }
  0xfc   :  { %158 = vst [vmem:[%s282_s3 + $0x18] sm:$0xff] %v154_v21 }
  0xfd   :  { %156 = vst [vmem:[%s282_s3 + $0x8] sm:$0xff] %v152_v22 }

// kernel: forward.6
= control target key start
LH: loop header
LB: loop body
LE: loop exit
PB: predicated region body
PF: predicated region fallthrough
CT: control target
= control target key end

     0   :  { %s354_s1 = inlined_call_operand.vmem [shape: bf16[256,128], index: 1, kind: input, shape index: {}]   ;;  %s355_s0 = inlined_call_operand.vmem [shape: bf16[16,256], index: 0, kind: input, shape index: {}]   ;;  %s356_s2 = inlined_call_operand.vmem [shape: f32[1,128], index: 2, kind: input, shape index: {}]   ;;  %s357_s3 = inlined_call_operand.vmem [shape: f32[16,128], index: 3, kind: output, shape index: {}]  }
   0x1   :  { %v252_v0 = vld [vmem:[%s354_s1 + $0x40] sm:$0xff]   ;;  %v254_v2 = vld [vmem:[%s354_s1 + $0x48] sm:$0xff]   ;;  %v256_v4 = vld [vmem:[%s354_s1 + $0x50] sm:$0xff]  }
   0x2   :  { %v253_v1 = vld [vmem:[%s354_s1] sm:$0xff]   ;;  %230 = vmatprep.subr.bf16.mxu0 %v252_v0  ;;  %v255_v3 = vld [vmem:[%s354_s1 + $0x8] sm:$0xff]   ;;  %v257_v5 = vld [vmem:[%s354_s1 + $0x10] sm:$0xff]  }
   0x3   :  { %231 = vmatpush3.bf16.msra.mxu0 %v253_v1  ;;  %v258_v6 = vld [vmem:[%s354_s1 + $0x58] sm:$0xff]   ;;  %v260_v8 = vld [vmem:[%s354_s1 + $0x60] sm:$0xff]   ;;  %v262_v10 = vld [vmem:[%s354_s1 + $0x68] sm:$0xff]  }
   0x4   :  { %232 = vmatprep.subr.bf16.mxu0 %v254_v2  ;;  %v259_v7 = vld [vmem:[%s354_s1 + $0x18] sm:$0xff]   ;;  %v261_v9 = vld [vmem:[%s354_s1 + $0x20] sm:$0xff]   ;;  %v263_v12 = vld [vmem:[%s354_s1 + $0x28] sm:$0xff]  }
   0x5   :  { %v270_v11 = vld [vmem:[%s355_s0 + $0x4] ss:$8 sps:$4 sm:$0xff]   ;;  %v264_v13 = vld [vmem:[%s354_s1 + $0x70] sm:$0xff]   ;;  %v266_v15 = vld [vmem:[%s354_s1 + $0x78] sm:$0xff]  }
   0x6   :  { %194 = vmatprep.mubr.bf16.mxu0 %v270_v11  ;;  %v265_v14 = vld [vmem:[%s354_s1 + $0x30] sm:$0xff]   ;;  %v267_v16 = vld [vmem:[%s354_s1 + $0x38] sm:$0xff]   ;;  %v268_v17 = vld [vmem:[%s355_s0] ss:$8 sps:$4 sm:$0xff]  }
   0x7   :  { %233 = vmatpush3.bf16.msra.mxu0 %v255_v3  ;;  %v211_v19 = vld [vmem:[%s356_s2] ss:$0 sm:$0xff] }
   0x8   :  { %234 = vmatprep.subr.bf16.mxu0 %v256_v4 }
   0xb   :  { %235 = vmatpush3.bf16.msra.mxu0 %v257_v5 }
   0xc   :  { %236 = vmatprep.subr.bf16.mxu0 %v258_v6 }
   0xf   :  { %237 = vmatpush3.bf16.msra.mxu0 %v259_v7 }
  0x10   :  { %238 = vmatprep.subr.bf16.mxu0 %v260_v8 }
  0x13   :  { %239 = vmatpush3.bf16.msra.mxu0 %v261_v9 }
  0x14   :  { %240 = vmatprep.subr.bf16.mxu0 %v262_v10 }
  0x17   :  { %241 = vmatpush3.bf16.msra.mxu0 %v263_v12 }
  0x18   :  { %242 = vmatprep.subr.bf16.mxu0 %v264_v13 }
  0x1b   :  { %243 = vmatpush3.bf16.msra.mxu0 %v265_v14 }
  0x1c   :  { %244 = vmatprep.subr.bf16.mxu0 %v266_v15 }
  0x1f   :  { %245 = vmatpush3.bf16.msra.mxu0 %v267_v16 }
  0x22   :  { %195 = vmatmul.mubr.bf16.vlgmr.msra.gmra.mrb[0].mxu0 %v268_v17 }
  0xf5   :  { %v246_v18 = vpop.f32.mrb[0].mxu0 }
  0xf6   :  { %v247_v20 = vpop.f32.mrb[1].mxu0 }
  0xf7   :  { %v248_v21 = vadd.f32 %v247_v20, %v246_v18  ;;  %v249_v22 = vpop.f32.mrb[2].mxu0 }
  0xf8   :  { %v250_v23 = vpop.f32.mrb[3].mxu0 }
  0xf9   :  { %v197_v24 = vadd.f32 %v248_v21, %v211_v19  ;;  %v251_v25 = vadd.f32 %v250_v23, %v249_v22 }
  0xfb   :  { %v203_v26 = vmax.f32 %v197_v24, 0.0  ;;  %v200_v27 = vadd.f32 %v251_v25, %v211_v19 }
  0xfd   :  { %205 = vst [vmem:[%s357_s3] sm:$0xff] %v203_v26  ;;  %v204_v28 = vmax.f32 %v200_v27, 0.0 }
  0xff   :  { %206 = vst [vmem:[%s357_s3 + $0x8] sm:$0xff] %v204_v28 }

// kernel: forward.7
= control target key start
LH: loop header
LB: loop body
LE: loop exit
PB: predicated region body
PF: predicated region fallthrough
CT: control target
= control target key end

     0   :  { %v433_v1 = vmov 0.0   ;;  %vm434_vm0 = vmmov 0   ;;  %s545_s1 = inlined_call_operand.vmem [shape: bf16[384,128], index: 1, kind: input, shape index: {}]   ;;  %s546_s0 = inlined_call_operand.vmem [shape: bf16[16,384], index: 0, kind: input, shape index: {}]   ;;  %s547_s2 = inlined_call_operand.vmem [shape: f32[1,128], index: 2, kind: input, shape index: {}]   ;;  %s548_s3 = inlined_call_operand.vmem [shape: f32[16,128], index: 3, kind: output, shape index: {}]  }
   0x1   :  { %v405_v0 = vld [vmem:[%s545_s1 + $0x40] sm:$0xff]   ;;  %383 = vmatprep.subr.bf16.mxu1 %v433_v1  ;;  %399 = vmatprep.mubr.msk.bf16.mxu1 %vm434_vm0, %v433_v1  ;;  %v408_v4 = vld [vmem:[%s545_s1 + $0x48] sm:$0xff]   ;;  %v411_v7 = vld [vmem:[%s545_s1 + $0x50] sm:$0xff]  }
   0x2   :  { %v406_v2 = vld [vmem:[%s545_s1] sm:$0xff]   ;;  %352 = vmatprep.subr.bf16.mxu0 %v405_v0  ;;  %v409_v5 = vld [vmem:[%s545_s1 + $0x8] sm:$0xff]   ;;  %v412_v8 = vld [vmem:[%s545_s1 + $0x10] sm:$0xff]  }
   0x3   :  { %v407_v3 = vld [vmem:[%s545_s1 + $0x80] sm:$0xff]   ;;  %353 = vmatpush3.bf16.msra.mxu0 %v406_v2  ;;  %v410_v6 = vld [vmem:[%s545_s1 + $0x88] sm:$0xff]   ;;  %v413_v9 = vld [vmem:[%s545_s1 + $0x90] sm:$0xff]  }
   0x4   :  { %384 = vmatpush3.bf16.msra.mxu1 %v407_v3  ;;  %354 = vmatprep.subr.bf16.mxu0 %v408_v4  ;;  %v414_v10 = vld [vmem:[%s545_s1 + $0x58] sm:$0xff]   ;;  %v417_v13 = vld [vmem:[%s545_s1 + $0x60] sm:$0xff]   ;;  %v420_v16 = vld [vmem:[%s545_s1 + $0x68] sm:$0xff]  }
   0x5   :  { %385 = vmatprep.subr.bf16.mxu1 %v433_v1  ;;  %v415_v11 = vld [vmem:[%s545_s1 + $0x18] sm:$0xff]   ;;  %v418_v14 = vld [vmem:[%s545_s1 + $0x20] sm:$0xff]   ;;  %v421_v17 = vld [vmem:[%s545_s1 + $0x28] sm:$0xff]  }
   0x6   :  { %v416_v12 = vld [vmem:[%s545_s1 + $0x98] sm:$0xff]   ;;  %v419_v15 = vld [vmem:[%s545_s1 + $0xa0] sm:$0xff]   ;;  %v422_v18 = vld [vmem:[%s545_s1 + $0xa8] sm:$0xff]  }
   0x7   :  { %355 = vmatpush3.bf16.msra.mxu0 %v409_v5  ;;  %v423_v19 = vld [vmem:[%s545_s1 + $0x70] sm:$0xff]   ;;  %v426_v22 = vld [vmem:[%s545_s1 + $0x78] sm:$0xff]   ;;  %v428_v26 = vld [vmem:[%s546_s0] ss:$12 sps:$4 sm:$0xff]  }
   0x8   :  { %386 = vmatpush3.bf16.msra.mxu1 %v410_v6  ;;  %356 = vmatprep.subr.bf16.mxu0 %v411_v7  ;;  %v424_v20 = vld [vmem:[%s545_s1 + $0x30] sm:$0xff]   ;;  %v427_v24 = vld [vmem:[%s545_s1 + $0x38] sm:$0xff]   ;;  %v324_v30 = vld [vmem:[%s547_s2] ss:$0 sm:$0xff] }
   0x9   :  { %387 = vmatprep.subr.bf16.mxu1 %v433_v1  ;;  %v425_v21 = vld [vmem:[%s545_s1 + $0xb0] sm:$0xff]   ;;  %v431_v25 = vld [vmem:[%s545_s1 + $0xb8] sm:$0xff]  }
   0xa   :  { %v430_v23 = vld [vmem:[%s546_s0 + $0x4] ss:$12 sps:$4 sm:$0xff]   ;;  %v432_v27 = vld [vmem:[%s546_s0 + $0x8] ss:$12 sps:$4 sm:$0xff]  }
   0xb   :  { %357 = vmatpush3.bf16.msra.mxu0 %v412_v8  ;;  %266 = vmatprep.mubr.bf16.mxu0 %v430_v23 }
   0xc   :  { %388 = vmatpush3.bf16.msra.mxu1 %v413_v9  ;;  %358 = vmatprep.subr.bf16.mxu0 %v414_v10 }
   0xd   :  { %389 = vmatprep.subr.bf16.mxu1 %v433_v1 }
   0xf   :  { %359 = vmatpush3.bf16.msra.mxu0 %v415_v11 }
  0x10   :  { %390 = vmatpush3.bf16.msra.mxu1 %v416_v12  ;;  %360 = vmatprep.subr.bf16.mxu0 %v417_v13 }
  0x11   :  { %391 = vmatprep.subr.bf16.mxu1 %v433_v1 }
  0x13   :  { %361 = vmatpush3.bf16.msra.mxu0 %v418_v14 }
  0x14   :  { %392 = vmatpush3.bf16.msra.mxu1 %v419_v15  ;;  %362 = vmatprep.subr.bf16.mxu0 %v420_v16 }
  0x15   :  { %393 = vmatprep.subr.bf16.mxu1 %v433_v1 }
  0x17   :  { %363 = vmatpush3.bf16.msra.mxu0 %v421_v17 }
  0x18   :  { %394 = vmatpush3.bf16.msra.mxu1 %v422_v18  ;;  %364 = vmatprep.subr.bf16.mxu0 %v423_v19 }
  0x19   :  { %395 = vmatprep.subr.bf16.mxu1 %v433_v1 }
  0x1b   :  { %365 = vmatpush3.bf16.msra.mxu0 %v424_v20 }
  0x1c   :  { %396 = vmatpush3.bf16.msra.mxu1 %v425_v21  ;;  %366 = vmatprep.subr.bf16.mxu0 %v426_v22 }
  0x1d   :  { %397 = vmatprep.subr.bf16.mxu1 %v433_v1 }
  0x1f   :  { %367 = vmatpush3.bf16.msra.mxu0 %v427_v24 }
  0x20   :  { %398 = vmatpush3.bf16.msra.mxu1 %v431_v25 }
  0x22   :  { %267 = vmatmul.mubr.bf16.vlgmr.msra.gmra.mrb[0].mxu0 %v428_v26 }
  0x23   :  { %400 = vmatmul.mubr.bf16.vlgmr.msra.gmra.mrb[0].mxu1 %v432_v27 }
  0xf5   :  { %v368_v28 = vpop.f32.mrb[0].mxu0 }
  0xf6   :  { %v369_v29 = vpop.f32.mrb[1].mxu0  ;;  %v309_v31 = vpop.f32.mrb[0].mxu1 }
  0xf7   :  { %v370_v32 = vadd.f32 %v369_v29, %v368_v28  ;;  %v371_v33 = vpop.f32.mrb[2].mxu0  ;;  %v401_v34 = vpop.f32.mrb[1].mxu1 }
  0xf8   :  { %v372_v35 = vpop.f32.mrb[3].mxu0  ;;  %v312_v36 = vpop.f32.mrb[2].mxu1 }
  0xf9   :  { %v269_v37 = vadd.f32 %v370_v32, %v324_v30  ;;  %v373_v38 = vadd.f32 %v372_v35, %v371_v33  ;;  %v402_v39 = vpop.f32.mrb[3].mxu1 }
  0xfb   :  { %v310_v40 = vadd.f32 %v309_v31, %v269_v37  ;;  %v272_v41 = vadd.f32 %v373_v38, %v324_v30 }
  0xfd   :  { %v316_v42 = vmax.f32 %v310_v40, 0.0  ;;  %v313_v43 = vadd.f32 %v312_v36, %v272_v41 }
  0xff   :  { %318 = vst [vmem:[%s548_s3] sm:$0xff] %v316_v42  ;;  %v317_v44 = vmax.f32 %v313_v43, 0.0 }
 0x101   :  { %319 = vst [vmem:[%s548_s3 + $0x8] sm:$0xff] %v317_v44 }

</bundles_post_ra>
